<compile_context>
chip_gen: v7x
topology: tpu7x:2x2x1
jax: 0.10.0
libtpu: 0.0.40
codegen_flags: <defaults>
</compile_context>

<pallas_src>
import jax
import jax.numpy as jnp
import numpy as np
from jax.experimental import pallas as pl
from jax.experimental.pallas import tpu as pltpu

GATE = 128   # one full 128-lane slot per gate: [ i | f | o | g ]
HPAD = 16    # padded recurrent-contraction dim (>= H, sublane multiple of 8)
OPAD = 128   # lane-dense output row (unmasked store; sliced host-side)


def lstm_kernel(x_ref, wih_ref, whh_ref, b_ref, wlin_ref, blin_ref, out_ref):
    """Whole-sequence LSTM recurrence + linear head, everything VMEM-resident.

    x_ref    : (T, D_in)        bf16
    wih_ref  : (D_in, 4*GATE)   bf16  W_ih repacked [i|f|o|g], lane-padded
    whh_ref  : (HPAD, 4*GATE)   bf16  W_hh repacked, rows zero-padded to HPAD
    b_ref    : (1, 4*GATE)      f32   b_ih + b_hh, repacked, lane-padded
    wlin_ref : (1, GATE)        f32   linear weight as a lane row (out_size=1)
    blin_ref : (1, OPAD)        f32   linear bias at lane 0, zeros elsewhere
    out_ref  : (1, OPAD)        f32
    """
    T = x_ref.shape[0]

    # Hoist the recurrent weights out of the loop.
    whh = whh_ref[...]

    # Input projection + bias hoisted out of the serial recurrence as a single
    # M=T MXU matmul; kept as a register value ((T, 512) f32 = 4 vregs), so no
    # VMEM scratch store/load sits on the per-step dependency chain.
    xg = jnp.dot(x_ref[...], wih_ref[...],
                 preferred_element_type=jnp.float32) + b_ref[...]    # (T, 4*GATE)

    h = jnp.zeros((1, GATE), jnp.float32)
    c = jnp.zeros((1, GATE), jnp.float32)

    # Static unroll (T is small & static): static sublane slices of xg.
    for t in range(T):
        # Only the tiny (1,HPAD)@(HPAD,4*GATE) h-projection is on the serial path.
        hg = jnp.dot(h[:, :HPAD].astype(jnp.bfloat16), whh,
                     preferred_element_type=jnp.float32)             # (1, 4*GATE)
        gates = xg[t:t + 1, :] + hg
        # [ i | f | o ] is one contiguous 3*128-lane slab: a single EUP tanh
        # pass via sigmoid(x) == 0.5*tanh(0.5*x) + 0.5; one more tanh for g.
        sig = 0.5 * jnp.tanh(0.5 * gates[:, :3 * GATE]) + 0.5
        g_g = jnp.tanh(gates[:, 3 * GATE:])
        i_g = sig[:, 0 * GATE:1 * GATE]
        f_g = sig[:, 1 * GATE:2 * GATE]
        o_g = sig[:, 2 * GATE:3 * GATE]
        # Padded lanes (>= H): gate pre-activations are exactly 0 there, so
        # c = 0.5*0 + 0.5*tanh(0) = 0 and h = 0.5*tanh(0) = 0 stay clean.
        c = f_g * c + i_g * g_g
        h = o_g * jnp.tanh(c)

    # Linear head (output_size == 1): VPU multiply + XLU cross-lane reduce —
    # no MXU weight push / drain on the kernel tail; lane-dense output row.
    s = jnp.sum(h * wlin_ref[...], axis=-1, keepdims=True)           # (1, 1)
    out_ref[...] = s + blin_ref[...]                                  # (1, OPAD)


def lstm_forward(x, packed, output_size):
    """x: (1, T, D_in) float32 (batch_first; batch must be 1).

    Returns (output_size,), matching PyTorch's `linear(hidden_state.squeeze())`.
    """
    assert x.shape[0] == 1, "PyTorch forward hard-codes h0/c0 for batch=1"
    x2d = x[0].astype(jnp.bfloat16)                       # (T, D_in) for the MXU
    wihP, whhP, bP, wlinP, blinP = packed

    vmem = pl.BlockSpec(memory_space=pltpu.MemorySpace.VMEM)
    out = pl.pallas_call(
        lstm_kernel,
        out_shape=jax.ShapeDtypeStruct((1, OPAD), jnp.float32),
        in_specs=[vmem] * 6,
        out_specs=vmem,
    )(x2d, wihP, whhP, bP, wlinP, blinP)
    return out[0, :output_size]                           # (output_size,)


def init_raw_params(key, input_size, hidden_size, output_size):
    """PyTorch-layout weights with U(-1/sqrt(H), 1/sqrt(H)) init."""
    k = 1.0 / np.sqrt(hidden_size)
    ks = jax.random.split(key, 6)
    w_ih = jax.random.uniform(ks[0], (4 * hidden_size, input_size), jnp.float32, -k, k)
    w_hh = jax.random.uniform(ks[1], (4 * hidden_size, hidden_size), jnp.float32, -k, k)
    b_ih = jax.random.uniform(ks[2], (4 * hidden_size,), jnp.float32, -k, k)
    b_hh = jax.random.uniform(ks[3], (4 * hidden_size,), jnp.float32, -k, k)
    w_lin = jax.random.uniform(ks[4], (output_size, hidden_size), jnp.float32, -k, k)
    b_lin = jax.random.uniform(ks[5], (output_size,), jnp.float32, -k, k)
    return (w_ih, w_hh, b_ih, b_hh, w_lin, b_lin)


def pack_params(raw, hidden_size):
    """Repack PyTorch (i,f,g,o) gate rows into kernel layout [i|f|o|g], each
    gate zero-padded to a full 128-lane slot; recurrent rows padded to HPAD;
    MXU weights cast to bf16; linear head packed as a single lane row."""
    w_ih, w_hh, b_ih, b_hh, w_lin, b_lin = raw
    H = hidden_size
    out_size = w_lin.shape[0]
    assert H <= HPAD and H <= GATE
    # TODO(synk): head is packed as a single lane row => output_size == 1 only
    # (the module default); a general output_size needs an MXU head instead.
    assert out_size == 1

    def gate_rows(w):   # PyTorch row order: i, f, g, o (each H rows)
        return w[0:H], w[H:2 * H], w[2 * H:3 * H], w[3 * H:4 * H]

    i_ih, f_ih, g_ih, o_ih = gate_rows(w_ih)
    i_hh, f_hh, g_hh, o_hh = gate_rows(w_hh)
    b = b_ih + b_hh
    i_b, f_b, g_b, o_b = b[0:H], b[H:2 * H], b[2 * H:3 * H], b[3 * H:4 * H]

    def pack_cols(blocks):
        # each block is (H, K); transpose to (K, H) and zero-pad lanes to GATE
        return jnp.concatenate(
            [jnp.pad(blk.T, ((0, 0), (0, GATE - H))) for blk in blocks], axis=1)

    wihP = pack_cols((i_ih, f_ih, o_ih, g_ih)).astype(jnp.bfloat16)    # (D_in, 4*GATE)
    whhP = jnp.pad(pack_cols((i_hh, f_hh, o_hh, g_hh)),
                   ((0, HPAD - H), (0, 0))).astype(jnp.bfloat16)       # (HPAD, 4*GATE)
    bP = jnp.concatenate(
        [jnp.pad(v, (0, GATE - H)) for v in (i_b, f_b, o_b, g_b)]
    ).reshape(1, -1).astype(jnp.float32)                               # (1, 4*GATE)
    wlinP = jnp.pad(w_lin[0], (0, GATE - H)).reshape(1, GATE)          # (1, GATE)
    blinP = jnp.pad(b_lin, (0, OPAD - out_size)).reshape(1, OPAD)      # (1, OPAD)
    return (wihP, whhP, bP, wlinP, blinP)


def lstm_reference(x, raw, *, matmul_dtype=jnp.float32):
    """Pure-JAX reference of the PyTorch forward (unpadded, original layout).

    matmul_dtype=bfloat16 mirrors the kernel's MXU input precision exactly.
    """
    w_ih, w_hh, b_ih, b_hh, w_lin, b_lin = raw
    H = w_hh.shape[1]
    x2d = x[0].astype(jnp.float32)
    h = jnp.zeros((1, H), jnp.float32)
    c = jnp.zeros((1, H), jnp.float32)
    bias = (b_ih + b_hh).reshape(1, -1)
    wihT = w_ih.T.astype(matmul_dtype)
    whhT = w_hh.T.astype(matmul_dtype)
    for t in range(x2d.shape[0]):
        gates = (jnp.dot(x2d[t:t + 1].astype(matmul_dtype), wihT,
                         preferred_element_type=jnp.float32)
                 + jnp.dot(h.astype(matmul_dtype), whhT,
                           preferred_element_type=jnp.float32)
                 + bias)
        i_g = jax.nn.sigmoid(gates[:, 0 * H:1 * H])
        f_g = jax.nn.sigmoid(gates[:, 1 * H:2 * H])
        g_g = jnp.tanh(gates[:, 2 * H:3 * H])
        o_g = jax.nn.sigmoid(gates[:, 3 * H:4 * H])
        c = f_g * c + i_g * g_g
        h = o_g * jnp.tanh(c)
    return (h @ w_lin.T + b_lin.reshape(1, -1))[0]


if __name__ == "__main__":
    # Small shapes consistent with the module: batch=1 (forced by h0/c0),
    # seq=8, input_size=128 (lane-aligned), hidden_size=10, output_size=1.
    input_size, hidden_size, output_size, seq = 128, 10, 1, 8

    key = jax.random.PRNGKey(0)
    pkey, xkey = jax.random.split(key)
    raw = init_raw_params(pkey, input_size, hidden_size, output_size)
    packed = pack_params(raw, hidden_size)
    x = jax.random.normal(xkey, (1, seq, input_size), jnp.float32)

    out = lstm_forward(x, packed, output_size)
    out = jax.block_until_ready(out)
    assert out.shape == (output_size,)

    # Tight check against a reference that mirrors the kernel's bf16 MXU inputs.
    ref_bf16 = lstm_reference(x, raw, matmul_dtype=jnp.bfloat16)
    np.testing.assert_allclose(np.asarray(out), np.asarray(ref_bf16),
                               rtol=1e-3, atol=1e-3)

    # Looser check against the exact f32 math of the PyTorch module.
    ref_f32 = lstm_reference(x, raw, matmul_dtype=jnp.float32)
    np.testing.assert_allclose(np.asarray(out), np.asarray(ref_f32),
                               rtol=5e-2, atol=5e-2)

    print("KERNEL_OK")
</pallas_src>

<mosaic_0001>
module attributes {stable_mosaic.version = 11 : i64} {
  func.func @lstm_kernel(%arg0: memref<8x128xbf16, #tpu.memory_space<vmem>>, %arg1: memref<128x512xbf16, #tpu.memory_space<vmem>>, %arg2: memref<16x512xbf16, #tpu.memory_space<vmem>>, %arg3: memref<1x512xf32, #tpu.memory_space<vmem>>, %arg4: memref<1x128xf32, #tpu.memory_space<vmem>>, %arg5: memref<1x128xf32, #tpu.memory_space<vmem>>, %arg6: memref<1x128xf32, #tpu.memory_space<vmem>>) attributes {dimension_semantics = [], scalar_prefetch = 0 : i64, scratch_operands = 0 : i64, tpu.core_type = #tpu.core_type<tc>} {
    %c0 = arith.constant 0 : index
    %c0_0 = arith.constant 0 : index
    %0 = vector.load %arg2[%c0, %c0_0] : memref<16x512xbf16, #tpu.memory_space<vmem>>, vector<16x512xbf16>
    %c0_1 = arith.constant 0 : index
    %c0_2 = arith.constant 0 : index
    %1 = vector.load %arg0[%c0_1, %c0_2] : memref<8x128xbf16, #tpu.memory_space<vmem>>, vector<8x128xbf16>
    %c0_3 = arith.constant 0 : index
    %c0_4 = arith.constant 0 : index
    %2 = vector.load %arg1[%c0_3, %c0_4] : memref<128x512xbf16, #tpu.memory_space<vmem>>, vector<128x512xbf16>
    %cst = arith.constant dense<0.000000e+00> : vector<8x512xf32>
    %3 = tpu.matmul %1, %2, %cst {dimension_numbers = #tpu.dot_dimension_numbers<[1], [0], [0], [1], [0, 0, 1, 1], [], []>} : vector<8x128xbf16>, vector<128x512xbf16>, vector<8x512xf32> -> vector<8x512xf32>
    %c0_5 = arith.constant 0 : index
    %c0_6 = arith.constant 0 : index
    %4 = vector.load %arg3[%c0_5, %c0_6] : memref<1x512xf32, #tpu.memory_space<vmem>>, vector<1x512xf32>
    %5 = vector.broadcast %4 : vector<1x512xf32> to vector<8x512xf32>
    %6 = arith.addf %3, %5 : vector<8x512xf32>
    %cst_7 = arith.constant 0.000000e+00 : f32
    %7 = vector.broadcast %cst_7 : f32 to vector<1x128xf32>
    %cst_8 = arith.constant 0.000000e+00 : f32
    %8 = vector.broadcast %cst_8 : f32 to vector<1x128xf32>
    %9 = vector.extract_strided_slice %7 {offsets = [0, 0], sizes = [1, 16], strides = [1, 1]} : vector<1x128xf32> to vector<1x16xf32>
    %10 = arith.truncf %9 : vector<1x16xf32> to vector<1x16xbf16>
    %cst_9 = arith.constant dense<0.000000e+00> : vector<1x512xf32>
    %11 = tpu.matmul %10, %0, %cst_9 {dimension_numbers = #tpu.dot_dimension_numbers<[1], [0], [0], [1], [0, 0, 1, 1], [], []>} : vector<1x16xbf16>, vector<16x512xbf16>, vector<1x512xf32> -> vector<1x512xf32>
    %12 = vector.extract_strided_slice %6 {offsets = [0, 0], sizes = [1, 512], strides = [1, 1]} : vector<8x512xf32> to vector<1x512xf32>
    %13 = arith.addf %12, %11 : vector<1x512xf32>
    %14 = vector.extract_strided_slice %13 {offsets = [0, 0], sizes = [1, 384], strides = [1, 1]} : vector<1x512xf32> to vector<1x384xf32>
    %cst_10 = arith.constant 5.000000e-01 : f32
    %15 = vector.broadcast %cst_10 : f32 to vector<1x384xf32>
    %16 = arith.mulf %15, %14 : vector<1x384xf32>
    %17 = math.tanh %16 : vector<1x384xf32>
    %cst_11 = arith.constant 5.000000e-01 : f32
    %18 = vector.broadcast %cst_11 : f32 to vector<1x384xf32>
    %19 = arith.mulf %18, %17 : vector<1x384xf32>
    %cst_12 = arith.constant 5.000000e-01 : f32
    %20 = vector.broadcast %cst_12 : f32 to vector<1x384xf32>
    %21 = arith.addf %19, %20 : vector<1x384xf32>
    %22 = vector.extract_strided_slice %13 {offsets = [0, 384], sizes = [1, 128], strides = [1, 1]} : vector<1x512xf32> to vector<1x128xf32>
    %23 = math.tanh %22 : vector<1x128xf32>
    %24 = vector.extract_strided_slice %21 {offsets = [0, 0], sizes = [1, 128], strides = [1, 1]} : vector<1x384xf32> to vector<1x128xf32>
    %25 = vector.extract_strided_slice %21 {offsets = [0, 128], sizes = [1, 128], strides = [1, 1]} : vector<1x384xf32> to vector<1x128xf32>
    %26 = vector.extract_strided_slice %21 {offsets = [0, 256], sizes = [1, 128], strides = [1, 1]} : vector<1x384xf32> to vector<1x128xf32>
    %27 = arith.mulf %25, %8 : vector<1x128xf32>
    %28 = arith.mulf %24, %23 : vector<1x128xf32>
    %29 = arith.addf %27, %28 : vector<1x128xf32>
    %30 = math.tanh %29 : vector<1x128xf32>
    %31 = arith.mulf %26, %30 : vector<1x128xf32>
    %32 = vector.extract_strided_slice %31 {offsets = [0, 0], sizes = [1, 16], strides = [1, 1]} : vector<1x128xf32> to vector<1x16xf32>
    %33 = arith.truncf %32 : vector<1x16xf32> to vector<1x16xbf16>
    %cst_13 = arith.constant dense<0.000000e+00> : vector<1x512xf32>
    %34 = tpu.matmul %33, %0, %cst_13 {dimension_numbers = #tpu.dot_dimension_numbers<[1], [0], [0], [1], [0, 0, 1, 1], [], []>} : vector<1x16xbf16>, vector<16x512xbf16>, vector<1x512xf32> -> vector<1x512xf32>
    %35 = vector.extract_strided_slice %6 {offsets = [1, 0], sizes = [1, 512], strides = [1, 1]} : vector<8x512xf32> to vector<1x512xf32>
    %36 = arith.addf %35, %34 : vector<1x512xf32>
    %37 = vector.extract_strided_slice %36 {offsets = [0, 0], sizes = [1, 384], strides = [1, 1]} : vector<1x512xf32> to vector<1x384xf32>
    %cst_14 = arith.constant 5.000000e-01 : f32
    %38 = vector.broadcast %cst_14 : f32 to vector<1x384xf32>
    %39 = arith.mulf %38, %37 : vector<1x384xf32>
    %40 = math.tanh %39 : vector<1x384xf32>
    %cst_15 = arith.constant 5.000000e-01 : f32
    %41 = vector.broadcast %cst_15 : f32 to vector<1x384xf32>
    %42 = arith.mulf %41, %40 : vector<1x384xf32>
    %cst_16 = arith.constant 5.000000e-01 : f32
    %43 = vector.broadcast %cst_16 : f32 to vector<1x384xf32>
    %44 = arith.addf %42, %43 : vector<1x384xf32>
    %45 = vector.extract_strided_slice %36 {offsets = [0, 384], sizes = [1, 128], strides = [1, 1]} : vector<1x512xf32> to vector<1x128xf32>
    %46 = math.tanh %45 : vector<1x128xf32>
    %47 = vector.extract_strided_slice %44 {offsets = [0, 0], sizes = [1, 128], strides = [1, 1]} : vector<1x384xf32> to vector<1x128xf32>
    %48 = vector.extract_strided_slice %44 {offsets = [0, 128], sizes = [1, 128], strides = [1, 1]} : vector<1x384xf32> to vector<1x128xf32>
    %49 = vector.extract_strided_slice %44 {offsets = [0, 256], sizes = [1, 128], strides = [1, 1]} : vector<1x384xf32> to vector<1x128xf32>
    %50 = arith.mulf %48, %29 : vector<1x128xf32>
    %51 = arith.mulf %47, %46 : vector<1x128xf32>
    %52 = arith.addf %50, %51 : vector<1x128xf32>
    %53 = math.tanh %52 : vector<1x128xf32>
    %54 = arith.mulf %49, %53 : vector<1x128xf32>
    %55 = vector.extract_strided_slice %54 {offsets = [0, 0], sizes = [1, 16], strides = [1, 1]} : vector<1x128xf32> to vector<1x16xf32>
    %56 = arith.truncf %55 : vector<1x16xf32> to vector<1x16xbf16>
    %cst_17 = arith.constant dense<0.000000e+00> : vector<1x512xf32>
    %57 = tpu.matmul %56, %0, %cst_17 {dimension_numbers = #tpu.dot_dimension_numbers<[1], [0], [0], [1], [0, 0, 1, 1], [], []>} : vector<1x16xbf16>, vector<16x512xbf16>, vector<1x512xf32> -> vector<1x512xf32>
    %58 = vector.extract_strided_slice %6 {offsets = [2, 0], sizes = [1, 512], strides = [1, 1]} : vector<8x512xf32> to vector<1x512xf32>
    %59 = arith.addf %58, %57 : vector<1x512xf32>
    %60 = vector.extract_strided_slice %59 {offsets = [0, 0], sizes = [1, 384], strides = [1, 1]} : vector<1x512xf32> to vector<1x384xf32>
    %cst_18 = arith.constant 5.000000e-01 : f32
    %61 = vector.broadcast %cst_18 : f32 to vector<1x384xf32>
    %62 = arith.mulf %61, %60 : vector<1x384xf32>
    %63 = math.tanh %62 : vector<1x384xf32>
    %cst_19 = arith.constant 5.000000e-01 : f32
    %64 = vector.broadcast %cst_19 : f32 to vector<1x384xf32>
    %65 = arith.mulf %64, %63 : vector<1x384xf32>
    %cst_20 = arith.constant 5.000000e-01 : f32
    %66 = vector.broadcast %cst_20 : f32 to vector<1x384xf32>
    %67 = arith.addf %65, %66 : vector<1x384xf32>
    %68 = vector.extract_strided_slice %59 {offsets = [0, 384], sizes = [1, 128], strides = [1, 1]} : vector<1x512xf32> to vector<1x128xf32>
    %69 = math.tanh %68 : vector<1x128xf32>
    %70 = vector.extract_strided_slice %67 {offsets = [0, 0], sizes = [1, 128], strides = [1, 1]} : vector<1x384xf32> to vector<1x128xf32>
    %71 = vector.extract_strided_slice %67 {offsets = [0, 128], sizes = [1, 128], strides = [1, 1]} : vector<1x384xf32> to vector<1x128xf32>
    %72 = vector.extract_strided_slice %67 {offsets = [0, 256], sizes = [1, 128], strides = [1, 1]} : vector<1x384xf32> to vector<1x128xf32>
    %73 = arith.mulf %71, %52 : vector<1x128xf32>
    %74 = arith.mulf %70, %69 : vector<1x128xf32>
    %75 = arith.addf %73, %74 : vector<1x128xf32>
    %76 = math.tanh %75 : vector<1x128xf32>
    %77 = arith.mulf %72, %76 : vector<1x128xf32>
    %78 = vector.extract_strided_slice %77 {offsets = [0, 0], sizes = [1, 16], strides = [1, 1]} : vector<1x128xf32> to vector<1x16xf32>
    %79 = arith.truncf %78 : vector<1x16xf32> to vector<1x16xbf16>
    %cst_21 = arith.constant dense<0.000000e+00> : vector<1x512xf32>
    %80 = tpu.matmul %79, %0, %cst_21 {dimension_numbers = #tpu.dot_dimension_numbers<[1], [0], [0], [1], [0, 0, 1, 1], [], []>} : vector<1x16xbf16>, vector<16x512xbf16>, vector<1x512xf32> -> vector<1x512xf32>
    %81 = vector.extract_strided_slice %6 {offsets = [3, 0], sizes = [1, 512], strides = [1, 1]} : vector<8x512xf32> to vector<1x512xf32>
    %82 = arith.addf %81, %80 : vector<1x512xf32>
    %83 = vector.extract_strided_slice %82 {offsets = [0, 0], sizes = [1, 384], strides = [1, 1]} : vector<1x512xf32> to vector<1x384xf32>
    %cst_22 = arith.constant 5.000000e-01 : f32
    %84 = vector.broadcast %cst_22 : f32 to vector<1x384xf32>
    %85 = arith.mulf %84, %83 : vector<1x384xf32>
    %86 = math.tanh %85 : vector<1x384xf32>
    %cst_23 = arith.constant 5.000000e-01 : f32
    %87 = vector.broadcast %cst_23 : f32 to vector<1x384xf32>
    %88 = arith.mulf %87, %86 : vector<1x384xf32>
    %cst_24 = arith.constant 5.000000e-01 : f32
    %89 = vector.broadcast %cst_24 : f32 to vector<1x384xf32>
    %90 = arith.addf %88, %89 : vector<1x384xf32>
    %91 = vector.extract_strided_slice %82 {offsets = [0, 384], sizes = [1, 128], strides = [1, 1]} : vector<1x512xf32> to vector<1x128xf32>
    %92 = math.tanh %91 : vector<1x128xf32>
    %93 = vector.extract_strided_slice %90 {offsets = [0, 0], sizes = [1, 128], strides = [1, 1]} : vector<1x384xf32> to vector<1x128xf32>
    %94 = vector.extract_strided_slice %90 {offsets = [0, 128], sizes = [1, 128], strides = [1, 1]} : vector<1x384xf32> to vector<1x128xf32>
    %95 = vector.extract_strided_slice %90 {offsets = [0, 256], sizes = [1, 128], strides = [1, 1]} : vector<1x384xf32> to vector<1x128xf32>
    %96 = arith.mulf %94, %75 : vector<1x128xf32>
    %97 = arith.mulf %93, %92 : vector<1x128xf32>
    %98 = arith.addf %96, %97 : vector<1x128xf32>
    %99 = math.tanh %98 : vector<1x128xf32>
    %100 = arith.mulf %95, %99 : vector<1x128xf32>
    %101 = vector.extract_strided_slice %100 {offsets = [0, 0], sizes = [1, 16], strides = [1, 1]} : vector<1x128xf32> to vector<1x16xf32>
    %102 = arith.truncf %101 : vector<1x16xf32> to vector<1x16xbf16>
    %cst_25 = arith.constant dense<0.000000e+00> : vector<1x512xf32>
    %103 = tpu.matmul %102, %0, %cst_25 {dimension_numbers = #tpu.dot_dimension_numbers<[1], [0], [0], [1], [0, 0, 1, 1], [], []>} : vector<1x16xbf16>, vector<16x512xbf16>, vector<1x512xf32> -> vector<1x512xf32>
    %104 = vector.extract_strided_slice %6 {offsets = [4, 0], sizes = [1, 512], strides = [1, 1]} : vector<8x512xf32> to vector<1x512xf32>
    %105 = arith.addf %104, %103 : vector<1x512xf32>
    %106 = vector.extract_strided_slice %105 {offsets = [0, 0], sizes = [1, 384], strides = [1, 1]} : vector<1x512xf32> to vector<1x384xf32>
    %cst_26 = arith.constant 5.000000e-01 : f32
    %107 = vector.broadcast %cst_26 : f32 to vector<1x384xf32>
    %108 = arith.mulf %107, %106 : vector<1x384xf32>
    %109 = math.tanh %108 : vector<1x384xf32>
    %cst_27 = arith.constant 5.000000e-01 : f32
    %110 = vector.broadcast %cst_27 : f32 to vector<1x384xf32>
    %111 = arith.mulf %110, %109 : vector<1x384xf32>
    %cst_28 = arith.constant 5.000000e-01 : f32
    %112 = vector.broadcast %cst_28 : f32 to vector<1x384xf32>
    %113 = arith.addf %111, %112 : vector<1x384xf32>
    %114 = vector.extract_strided_slice %105 {offsets = [0, 384], sizes = [1, 128], strides = [1, 1]} : vector<1x512xf32> to vector<1x128xf32>
    %115 = math.tanh %114 : vector<1x128xf32>
    %116 = vector.extract_strided_slice %113 {offsets = [0, 0], sizes = [1, 128], strides = [1, 1]} : vector<1x384xf32> to vector<1x128xf32>
    %117 = vector.extract_strided_slice %113 {offsets = [0, 128], sizes = [1, 128], strides = [1, 1]} : vector<1x384xf32> to vector<1x128xf32>
    %118 = vector.extract_strided_slice %113 {offsets = [0, 256], sizes = [1, 128], strides = [1, 1]} : vector<1x384xf32> to vector<1x128xf32>
    %119 = arith.mulf %117, %98 : vector<1x128xf32>
    %120 = arith.mulf %116, %115 : vector<1x128xf32>
    %121 = arith.addf %119, %120 : vector<1x128xf32>
    %122 = math.tanh %121 : vector<1x128xf32>
    %123 = arith.mulf %118, %122 : vector<1x128xf32>
    %124 = vector.extract_strided_slice %123 {offsets = [0, 0], sizes = [1, 16], strides = [1, 1]} : vector<1x128xf32> to vector<1x16xf32>
    %125 = arith.truncf %124 : vector<1x16xf32> to vector<1x16xbf16>
    %cst_29 = arith.constant dense<0.000000e+00> : vector<1x512xf32>
    %126 = tpu.matmul %125, %0, %cst_29 {dimension_numbers = #tpu.dot_dimension_numbers<[1], [0], [0], [1], [0, 0, 1, 1], [], []>} : vector<1x16xbf16>, vector<16x512xbf16>, vector<1x512xf32> -> vector<1x512xf32>
    %127 = vector.extract_strided_slice %6 {offsets = [5, 0], sizes = [1, 512], strides = [1, 1]} : vector<8x512xf32> to vector<1x512xf32>
    %128 = arith.addf %127, %126 : vector<1x512xf32>
    %129 = vector.extract_strided_slice %128 {offsets = [0, 0], sizes = [1, 384], strides = [1, 1]} : vector<1x512xf32> to vector<1x384xf32>
    %cst_30 = arith.constant 5.000000e-01 : f32
    %130 = vector.broadcast %cst_30 : f32 to vector<1x384xf32>
    %131 = arith.mulf %130, %129 : vector<1x384xf32>
    %132 = math.tanh %131 : vector<1x384xf32>
    %cst_31 = arith.constant 5.000000e-01 : f32
    %133 = vector.broadcast %cst_31 : f32 to vector<1x384xf32>
    %134 = arith.mulf %133, %132 : vector<1x384xf32>
    %cst_32 = arith.constant 5.000000e-01 : f32
    %135 = vector.broadcast %cst_32 : f32 to vector<1x384xf32>
    %136 = arith.addf %134, %135 : vector<1x384xf32>
    %137 = vector.extract_strided_slice %128 {offsets = [0, 384], sizes = [1, 128], strides = [1, 1]} : vector<1x512xf32> to vector<1x128xf32>
    %138 = math.tanh %137 : vector<1x128xf32>
    %139 = vector.extract_strided_slice %136 {offsets = [0, 0], sizes = [1, 128], strides = [1, 1]} : vector<1x384xf32> to vector<1x128xf32>
    %140 = vector.extract_strided_slice %136 {offsets = [0, 128], sizes = [1, 128], strides = [1, 1]} : vector<1x384xf32> to vector<1x128xf32>
    %141 = vector.extract_strided_slice %136 {offsets = [0, 256], sizes = [1, 128], strides = [1, 1]} : vector<1x384xf32> to vector<1x128xf32>
    %142 = arith.mulf %140, %121 : vector<1x128xf32>
    %143 = arith.mulf %139, %138 : vector<1x128xf32>
    %144 = arith.addf %142, %143 : vector<1x128xf32>
    %145 = math.tanh %144 : vector<1x128xf32>
    %146 = arith.mulf %141, %145 : vector<1x128xf32>
    %147 = vector.extract_strided_slice %146 {offsets = [0, 0], sizes = [1, 16], strides = [1, 1]} : vector<1x128xf32> to vector<1x16xf32>
    %148 = arith.truncf %147 : vector<1x16xf32> to vector<1x16xbf16>
    %cst_33 = arith.constant dense<0.000000e+00> : vector<1x512xf32>
    %149 = tpu.matmul %148, %0, %cst_33 {dimension_numbers = #tpu.dot_dimension_numbers<[1], [0], [0], [1], [0, 0, 1, 1], [], []>} : vector<1x16xbf16>, vector<16x512xbf16>, vector<1x512xf32> -> vector<1x512xf32>
    %150 = vector.extract_strided_slice %6 {offsets = [6, 0], sizes = [1, 512], strides = [1, 1]} : vector<8x512xf32> to vector<1x512xf32>
    %151 = arith.addf %150, %149 : vector<1x512xf32>
    %152 = vector.extract_strided_slice %151 {offsets = [0, 0], sizes = [1, 384], strides = [1, 1]} : vector<1x512xf32> to vector<1x384xf32>
    %cst_34 = arith.constant 5.000000e-01 : f32
    %153 = vector.broadcast %cst_34 : f32 to vector<1x384xf32>
    %154 = arith.mulf %153, %152 : vector<1x384xf32>
    %155 = math.tanh %154 : vector<1x384xf32>
    %cst_35 = arith.constant 5.000000e-01 : f32
    %156 = vector.broadcast %cst_35 : f32 to vector<1x384xf32>
    %157 = arith.mulf %156, %155 : vector<1x384xf32>
    %cst_36 = arith.constant 5.000000e-01 : f32
    %158 = vector.broadcast %cst_36 : f32 to vector<1x384xf32>
    %159 = arith.addf %157, %158 : vector<1x384xf32>
    %160 = vector.extract_strided_slice %151 {offsets = [0, 384], sizes = [1, 128], strides = [1, 1]} : vector<1x512xf32> to vector<1x128xf32>
    %161 = math.tanh %160 : vector<1x128xf32>
    %162 = vector.extract_strided_slice %159 {offsets = [0, 0], sizes = [1, 128], strides = [1, 1]} : vector<1x384xf32> to vector<1x128xf32>
    %163 = vector.extract_strided_slice %159 {offsets = [0, 128], sizes = [1, 128], strides = [1, 1]} : vector<1x384xf32> to vector<1x128xf32>
    %164 = vector.extract_strided_slice %159 {offsets = [0, 256], sizes = [1, 128], strides = [1, 1]} : vector<1x384xf32> to vector<1x128xf32>
    %165 = arith.mulf %163, %144 : vector<1x128xf32>
    %166 = arith.mulf %162, %161 : vector<1x128xf32>
    %167 = arith.addf %165, %166 : vector<1x128xf32>
    %168 = math.tanh %167 : vector<1x128xf32>
    %169 = arith.mulf %164, %168 : vector<1x128xf32>
    %170 = vector.extract_strided_slice %169 {offsets = [0, 0], sizes = [1, 16], strides = [1, 1]} : vector<1x128xf32> to vector<1x16xf32>
    %171 = arith.truncf %170 : vector<1x16xf32> to vector<1x16xbf16>
    %cst_37 = arith.constant dense<0.000000e+00> : vector<1x512xf32>
    %172 = tpu.matmul %171, %0, %cst_37 {dimension_numbers = #tpu.dot_dimension_numbers<[1], [0], [0], [1], [0, 0, 1, 1], [], []>} : vector<1x16xbf16>, vector<16x512xbf16>, vector<1x512xf32> -> vector<1x512xf32>
    %173 = vector.extract_strided_slice %6 {offsets = [7, 0], sizes = [1, 512], strides = [1, 1]} : vector<8x512xf32> to vector<1x512xf32>
    %174 = arith.addf %173, %172 : vector<1x512xf32>
    %175 = vector.extract_strided_slice %174 {offsets = [0, 0], sizes = [1, 384], strides = [1, 1]} : vector<1x512xf32> to vector<1x384xf32>
    %cst_38 = arith.constant 5.000000e-01 : f32
    %176 = vector.broadcast %cst_38 : f32 to vector<1x384xf32>
    %177 = arith.mulf %176, %175 : vector<1x384xf32>
    %178 = math.tanh %177 : vector<1x384xf32>
    %cst_39 = arith.constant 5.000000e-01 : f32
    %179 = vector.broadcast %cst_39 : f32 to vector<1x384xf32>
    %180 = arith.mulf %179, %178 : vector<1x384xf32>
    %cst_40 = arith.constant 5.000000e-01 : f32
    %181 = vector.broadcast %cst_40 : f32 to vector<1x384xf32>
    %182 = arith.addf %180, %181 : vector<1x384xf32>
    %183 = vector.extract_strided_slice %174 {offsets = [0, 384], sizes = [1, 128], strides = [1, 1]} : vector<1x512xf32> to vector<1x128xf32>
    %184 = math.tanh %183 : vector<1x128xf32>
    %185 = vector.extract_strided_slice %182 {offsets = [0, 0], sizes = [1, 128], strides = [1, 1]} : vector<1x384xf32> to vector<1x128xf32>
    %186 = vector.extract_strided_slice %182 {offsets = [0, 128], sizes = [1, 128], strides = [1, 1]} : vector<1x384xf32> to vector<1x128xf32>
    %187 = vector.extract_strided_slice %182 {offsets = [0, 256], sizes = [1, 128], strides = [1, 1]} : vector<1x384xf32> to vector<1x128xf32>
    %188 = arith.mulf %186, %167 : vector<1x128xf32>
    %189 = arith.mulf %185, %184 : vector<1x128xf32>
    %190 = arith.addf %188, %189 : vector<1x128xf32>
    %191 = math.tanh %190 : vector<1x128xf32>
    %192 = arith.mulf %187, %191 : vector<1x128xf32>
    %c0_41 = arith.constant 0 : index
    %c0_42 = arith.constant 0 : index
    %193 = vector.load %arg4[%c0_41, %c0_42] : memref<1x128xf32, #tpu.memory_space<vmem>>, vector<1x128xf32>
    %194 = arith.mulf %192, %193 : vector<1x128xf32>
    %cst_43 = arith.constant dense<0.000000e+00> : vector<1xf32>
    %195 = vector.multi_reduction <add>, %194, %cst_43 [1] : vector<1x128xf32> to vector<1xf32>
    %196 = vector.shape_cast %195 : vector<1xf32> to vector<1x1xf32>
    %c0_44 = arith.constant 0 : index
    %c0_45 = arith.constant 0 : index
    %197 = vector.load %arg5[%c0_44, %c0_45] : memref<1x128xf32, #tpu.memory_space<vmem>>, vector<1x128xf32>
    %198 = vector.broadcast %196 : vector<1x1xf32> to vector<1x128xf32>
    %199 = arith.addf %198, %197 : vector<1x128xf32>
    %c0_46 = arith.constant 0 : index
    %c0_47 = arith.constant 0 : index
    %200 = vector.load %arg6[%c0_46, %c0_47] : memref<1x128xf32, #tpu.memory_space<vmem>>, vector<1x128xf32>
    tpu.vector_store %arg6[%c0_46, %c0_47], %199 {strides = array<i32>} : memref<1x128xf32, #tpu.memory_space<vmem>>, vector<1x128xf32>,
    return
  }
}

</mosaic_0001>

<bundles_post_ra>
// kernel: tpu_custom_call.1
= control target key start
LH: loop header
LB: loop body
LE: loop exit
PB: predicated region body
PF: predicated region fallthrough
CT: control target
= control target key end

     0   :  { %11 = vsyncpa [#allocation3], 0  ;;  %s1914_s0 = inlined_call_operand.hbm [shape: bf16[8,128], index: 0, kind: input, shape index: {}]   ;;  %s1915_s1 = inlined_call_operand.hbm [shape: bf16[128,512], index: 1, kind: input, shape index: {}]   ;;  %s1916_s2 = inlined_call_operand.hbm [shape: bf16[16,512], index: 2, kind: input, shape index: {}]   ;;  %s1917_s3 = inlined_call_operand.vmem [shape: f32[1,512], index: 3, kind: input, shape index: {}]   ;;  %s1918_s4 = inlined_call_operand.vmem [shape: f32[1,128], index: 4, kind: input, shape index: {}]   ;;  %s1919_s5 = inlined_call_operand.vmem [shape: f32[1,128], index: 5, kind: input, shape index: {}]   ;;  %s1920_s6 = inlined_call_operand.hbm [shape: f32[1,128], index: 6, kind: output, shape index: {}]  }
   0x1   :  { %12 = vsyncpa [#allocation6], 0 }
   0x2   :  { %13 = vsyncpa [#allocation4], 0  ;;  %s1695_s21 = smov [#allocation5]   ;;  %s1601_s25 = scalar_lea.hbm %s1915_s1, 4096 }
   0x3   :  { %s29_s22 = sshll.u32 %s1695_s21, 4  ;;  %p1602_p0 = scmp.ne.s32.totalorder %s1915_s1, %s1601_s25  ;;  %s30_s22 = int_to_ptr.vmem [resolvable:$true] %s29_s22 }
   0x4   :  { %p1605_p1 = scmp.lt.u32.totalorder %s1601_s25, %s1915_s1 }
   0x6   :  { %p1607_p2 = pnand %p1605_p1, %p1602_p0 }
   0x8   :  { %1610 = shalt.err (!%p1607_p2)
}
   0x9   :  { %s1611_s30 = scalar_lea.vmem %s30_s22, 4096  ;;  %p1616_p4 = scmp.lt.s32.totalorder %s30_s22, %s30_s22 }
   0xa   :  { %p1612_p3 = scmp.ne.s32.totalorder %s30_s22, %s1611_s30  ;;  %p1617_p5 = scmp.lt.s32.totalorder %s1611_s30, %s1611_s30 }
   0xc   :  { %p1618_p6 = por %p1617_p5, %p1616_p4 }
   0xe   :  { %p1619_p7 = pnand %p1618_p6, %p1612_p3 }
  0x10   :  { %1622 = shalt.err (!%p1619_p7)
}
  0x11   :  { %s1696_s7 = smov 256   ;;  %s1697_s8 = smov 16  }
  0x12   :  { %35 = dma.hbm_to_vmem [thread:$0]  %s1915_s1, 4096, %s30_s22, [#allocation6], %s1696_s7, %s1696_s7, %s1697_s8  }
  0x13   :  { %s1698_s11 = smov [#allocation2]   ;;  %s1699_s13 = smov [#allocation7]  }
  0x14   :  { %s20_s12 = sshll.u32 %s1698_s11, 4  ;;  %s41_s14 = sshll.u32 %s1699_s13, 4  ;;  %s21_s12 = int_to_ptr.vmem [resolvable:$true] %s20_s12  ;;  %s42_s14 = int_to_ptr.vmem [resolvable:$true] %s41_s14 }
  0x15   :  { %s1623_s17 = scalar_lea.hbm %s1914_s0, 64 }
  0x16   :  { %p1624_p8 = scmp.ne.s32.totalorder %s1914_s0, %s1623_s17  ;;  %p1627_p9 = scmp.lt.u32.totalorder %s1623_s17, %s1914_s0 }
  0x18   :  { %p1629_p10 = pnand %p1627_p9, %p1624_p8 }
  0x1a   :  { %1632 = shalt.err (!%p1629_p10)
}
  0x1b   :  { %s1633_s1 = scalar_lea.vmem %s21_s12, 64  ;;  %p1638_p12 = scmp.lt.s32.totalorder %s21_s12, %s21_s12 }
  0x1c   :  { %p1634_p11 = scmp.ne.s32.totalorder %s21_s12, %s1633_s1  ;;  %p1639_p13 = scmp.lt.s32.totalorder %s1633_s1, %s1633_s1 }
  0x1e   :  { %p1640_p0 = por %p1639_p13, %p1638_p12 }
  0x20   :  { %p1641_p1 = pnand %p1640_p0, %p1634_p11 }
  0x22   :  { %1644 = shalt.err (!%p1641_p1)
}
  0x23   :  { %23 = dma.hbm_to_vmem [thread:$0]  %s1914_s0, 64, %s21_s12, [#allocation3]  }
  0x24   :  { %s1645_s26 = scalar_lea.hbm %s1916_s2, 512 }
  0x25   :  { %p1646_p2 = scmp.ne.s32.totalorder %s1916_s2, %s1645_s26  ;;  %p1649_p3 = scmp.lt.u32.totalorder %s1645_s26, %s1916_s2 }
  0x27   :  { %p1651_p4 = pnand %p1649_p3, %p1646_p2 }
  0x29   :  { %1654 = shalt.err (!%p1651_p4)
}
  0x2a   :  { %s1655_s9 = scalar_lea.vmem %s42_s14, 512  ;;  %p1660_p6 = scmp.lt.s32.totalorder %s42_s14, %s42_s14 }
  0x2b   :  { %p1656_p5 = scmp.ne.s32.totalorder %s42_s14, %s1655_s9  ;;  %p1661_p7 = scmp.lt.s32.totalorder %s1655_s9, %s1655_s9 }
  0x2d   :  { %p1662_p8 = por %p1661_p7, %p1660_p6 }
  0x2f   :  { %p1663_p9 = pnand %p1662_p8, %p1656_p5 }
  0x31   :  { %1666 = shalt.err (!%p1663_p9)
}
  0x32   :  { %47 = dma.hbm_to_vmem [thread:$0]  %s1916_s2, 512, %s42_s14, [#allocation6], %s1696_s7, %s1696_s7, %s1697_s8  }
  0x33   :  { %1689 = dma.done.wait [#allocation3], 64  }
  0x34   :  { %1690 = vsyncadd [#allocation3], 4294967232 }
  0x35   :  { %1691 = dma.done.wait [#allocation6], 4608  }
  0x36   :  { %1692 = vsyncadd [#allocation6], 4294962688  ;;  %v1700_v0 = vmov 0   ;;  %v1467_v1 = vld [vmem:[#allocation5 + $0x4] ss:$16 sps:$4 sm:$0xff]   ;;  %v103_v38 = vlaneseq  ;;  %vm385_vm0 = vcmask 130048  }
  0x37   :  { %315 = vmatprep.mubr.bf16.mxu0 %v1700_v0  ;;  %356 = vmatprep.mubr.bf16.mxu1 %v1700_v0  ;;  %v1469_v2 = vld [vmem:[#allocation5 + $0xc] ss:$16 sps:$4 sm:$0xff]   ;;  %v1471_v3 = vld [vmem:[#allocation5] ss:$16 sps:$4 sm:$0xff]   ;;  %v1472_v4 = vld [vmem:[#allocation5 + $0x8] ss:$16 sps:$4 sm:$0xff]  }
  0x38   :  { %283 = vmatprep.subr.bf16.mxu0 %v1467_v1  ;;  %324 = vmatprep.subr.bf16.mxu1 %v1469_v2  ;;  %v1473_v5 = vld [vmem:[#allocation5 + $0x24] ss:$16 sps:$4 sm:$0xff]   ;;  %v1475_v6 = vld [vmem:[#allocation5 + $0x2c] ss:$16 sps:$4 sm:$0xff]   ;;  %v1477_v7 = vld [vmem:[#allocation5 + $0x20] ss:$16 sps:$4 sm:$0xff]  }
  0x39   :  { %284 = vmatpush1.bf16.msra.mxu0 %v1471_v3  ;;  %325 = vmatpush1.bf16.msra.mxu1 %v1472_v4  ;;  %v1478_v8 = vld [vmem:[#allocation5 + $0x28] ss:$16 sps:$4 sm:$0xff]   ;;  %v1479_v9 = vld [vmem:[#allocation5 + $0x44] ss:$16 sps:$4 sm:$0xff]   ;;  %v1481_v10 = vld [vmem:[#allocation5 + $0x4c] ss:$16 sps:$4 sm:$0xff]  }
  0x3a   :  { %285 = vmatprep.subr.bf16.mxu0 %v1473_v5  ;;  %326 = vmatprep.subr.bf16.mxu1 %v1475_v6  ;;  %v1483_v11 = vld [vmem:[#allocation5 + $0x40] ss:$16 sps:$4 sm:$0xff]   ;;  %v1484_v12 = vld [vmem:[#allocation5 + $0x48] ss:$16 sps:$4 sm:$0xff]   ;;  %v1485_v13 = vld [vmem:[#allocation5 + $0x64] ss:$16 sps:$4 sm:$0xff]  }
  0x3b   :  { %v1487_v14 = vld [vmem:[#allocation5 + $0x6c] ss:$16 sps:$4 sm:$0xff]   ;;  %v1489_v15 = vld [vmem:[#allocation5 + $0x60] ss:$16 sps:$4 sm:$0xff]   ;;  %v1490_v16 = vld [vmem:[#allocation5 + $0x68] ss:$16 sps:$4 sm:$0xff]  }
  0x3c   :  { %v1491_v17 = vld [vmem:[#allocation5 + $0x84] ss:$16 sps:$4 sm:$0xff]   ;;  %v1493_v18 = vld [vmem:[#allocation5 + $0x8c] ss:$16 sps:$4 sm:$0xff]   ;;  %v1495_v19 = vld [vmem:[#allocation5 + $0x80] ss:$16 sps:$4 sm:$0xff]  }
  0x3d   :  { %286 = vmatpush1.bf16.msra.mxu0 %v1477_v7  ;;  %327 = vmatpush1.bf16.msra.mxu1 %v1478_v8  ;;  %v1496_v20 = vld [vmem:[#allocation5 + $0x88] ss:$16 sps:$4 sm:$0xff]   ;;  %v1497_v21 = vld [vmem:[#allocation5 + $0xa4] ss:$16 sps:$4 sm:$0xff]   ;;  %v1499_v22 = vld [vmem:[#allocation5 + $0xac] ss:$16 sps:$4 sm:$0xff]  }
  0x3e   :  { %287 = vmatprep.subr.bf16.mxu0 %v1479_v9  ;;  %328 = vmatprep.subr.bf16.mxu1 %v1481_v10  ;;  %v1501_v23 = vld [vmem:[#allocation5 + $0xa0] ss:$16 sps:$4 sm:$0xff]   ;;  %v1502_v24 = vld [vmem:[#allocation5 + $0xa8] ss:$16 sps:$4 sm:$0xff]   ;;  %v1503_v25 = vld [vmem:[#allocation5 + $0xc4] ss:$16 sps:$4 sm:$0xff]  }
  0x3f   :  { %v1505_v26 = vld [vmem:[#allocation5 + $0xcc] ss:$16 sps:$4 sm:$0xff]   ;;  %v1507_v27 = vld [vmem:[#allocation5 + $0xc0] ss:$16 sps:$4 sm:$0xff]   ;;  %v1508_v28 = vld [vmem:[#allocation5 + $0xc8] ss:$16 sps:$4 sm:$0xff]  }
  0x40   :  { %v1509_v29 = vld [vmem:[#allocation5 + $0xe4] ss:$16 sps:$4 sm:$0xff]   ;;  %v1511_v30 = vld [vmem:[#allocation5 + $0xec] ss:$16 sps:$4 sm:$0xff]   ;;  %v1513_v31 = vld [vmem:[#allocation5 + $0xe0] ss:$16 sps:$4 sm:$0xff]  }
  0x41   :  { %288 = vmatpush1.bf16.msra.mxu0 %v1483_v11  ;;  %329 = vmatpush1.bf16.msra.mxu1 %v1484_v12  ;;  %v1514_v32 = vld [vmem:[#allocation5 + $0xe8] ss:$16 sps:$4 sm:$0xff]   ;;  %v1781_v33 = vld [vmem:[#allocation7 + $0x4] ss:$16 sps:$4 sm:$0xff]   ;;  %v1783_v34 = vld [vmem:[#allocation7 + $0xc] ss:$16 sps:$4 sm:$0xff]  }
  0x42   :  { %289 = vmatprep.subr.bf16.mxu0 %v1485_v13  ;;  %330 = vmatprep.subr.bf16.mxu1 %v1487_v14  ;;  %v68_v35 = vld [vmem:[#allocation2] sm:$0xf]  ;;  %v1785_v36 = vld [vmem:[#allocation7] ss:$16 sps:$4 sm:$0xff]   ;;  %v1787_v37 = vld [vmem:[#allocation7 + $0x8] ss:$16 sps:$4 sm:$0xff]  }
  0x43   :  { %v104_v39 = vshrl.u32 %v103_v38, 7  ;;  %v101_v41 = vld [vmem:[%s1917_s3] sm:$0xf]  ;;  %vm1379_vm1 = vcmask 1047559   ;;  %s1701_s13 = smov [#allocation8]  }
  0x44   :  { %s1398_s14 = sshll.u32 %s1701_s13, 4  ;;  %s1399_s14 = int_to_ptr.vmem [resolvable:$true] %s1398_s14 }
  0x45   :  { %290 = vmatpush1.bf16.msra.mxu0 %v1489_v15  ;;  %331 = vmatpush1.bf16.msra.mxu1 %v1490_v16  ;;  %v105_v40 = vsub.s32 0, %v104_v39  ;;  %v109_v43 = vsub.s32 1, %v104_v39  ;;  %v117_v46 = vsub.s32 3, %v104_v39  ;;  %v113_v55 = vsub.s32 2, %v104_v39  ;;  %s1667_s15 = scalar_lea.vmem %s1399_s14, 16  ;;  %s1671_s16 = scalar_lea.vmem %s1399_s14, 32 }
  0x46   :  { %291 = vmatprep.subr.bf16.mxu0 %v1491_v17  ;;  %332 = vmatprep.subr.bf16.mxu1 %v1493_v18  ;;  %p1668_p10 = scmp.ne.s32.totalorder %s1399_s14, %s1667_s15  ;;  %p1672_p11 = scmp.lt.s32.totalorder %s1399_s14, %s1399_s14 }
  0x47   :  { %v106_v50 = vrot.slane %v101_v41, %v105_v40  ;;  %v110_v53 = vrot.slane %v101_v41, %v109_v43  ;;  %v118_v54 = vrot.slane %v101_v41, %v117_v46  ;;  %v114_v1 = vrot.slane %v101_v41, %v113_v55  ;;  %p1673_p12 = scmp.lt.s32.totalorder %s1671_s16, %s1667_s15 }
  0x49   :  { %292 = vmatpush1.bf16.msra.mxu0 %v1495_v19  ;;  %333 = vmatpush1.bf16.msra.mxu1 %v1496_v20  ;;  %p1674_p13 = por %p1673_p12, %p1672_p11 }
  0x4a   :  { %293 = vmatprep.subr.bf16.mxu0 %v1497_v21  ;;  %334 = vmatprep.subr.bf16.mxu1 %v1499_v22 }
  0x4b   :  { %p1675_p0 = pnand %p1674_p13, %p1668_p10 }
  0x4d   :  { %294 = vmatpush1.bf16.msra.mxu0 %v1501_v23  ;;  %335 = vmatpush1.bf16.msra.mxu1 %v1502_v24 }
  0x4e   :  { %295 = vmatprep.subr.bf16.mxu0 %v1503_v25  ;;  %336 = vmatprep.subr.bf16.mxu1 %v1505_v26 }
  0x51   :  { %296 = vmatpush1.bf16.msra.mxu0 %v1507_v27  ;;  %337 = vmatpush1.bf16.msra.mxu1 %v1508_v28 }
  0x52   :  { %297 = vmatprep.subr.bf16.mxu0 %v1509_v29  ;;  %338 = vmatprep.subr.bf16.mxu1 %v1511_v30 }
  0x55   :  { %298 = vmatpush1.bf16.msra.mxu0 %v1513_v31  ;;  %339 = vmatpush1.bf16.msra.mxu1 %v1514_v32 }
  0x56   :  { %389 = vmatprep.subr.bf16.mxu0 %v1781_v33  ;;  %430 = vmatprep.subr.bf16.mxu1 %v1783_v34 }
  0x58   :  { %316 = vmatmul.mubr.bf16.vlgmr.msra.gmra.mrb[0].mxu0 %v68_v35  ;;  %357 = vmatmul.mubr.bf16.vlgmr.msra.gmra.mrb[0].mxu1 %v68_v35 }
  0x59   :  { %390 = vmatpush1.bf16.msra.mxu0 %v1785_v36  ;;  %431 = vmatpush1.bf16.msra.mxu1 %v1787_v37 }
  0x5a   :  { %421 = vmatprep.mubr.bf16.mxu0 %v1700_v0  ;;  %462 = vmatprep.mubr.bf16.mxu1 %v1700_v0 }
  0x5b   :  { %497 = vmatprep.subr.bf16.mxu0 %v1781_v33  ;;  %538 = vmatprep.subr.bf16.mxu1 %v1783_v34 }
  0x60   :  { %422 = vmatmul.mubr.bf16.vlgmr.msra.gmra.mrb[4].mxu0 %v1700_v0  ;;  %463 = vmatmul.mubr.bf16.vlgmr.msra.gmra.mrb[4].mxu1 %v1700_v0 }
  0x61   :  { %498 = vmatpush1.bf16.msra.mxu0 %v1785_v36  ;;  %539 = vmatpush1.bf16.msra.mxu1 %v1787_v37 }
  0x62   :  { %529 = vmatprep.mubr.bf16.mxu0 %v1700_v0  ;;  %570 = vmatprep.mubr.bf16.mxu1 %v1700_v0 }
  0x63   :  { %623 = vmatprep.subr.bf16.mxu0 %v1781_v33  ;;  %664 = vmatprep.subr.bf16.mxu1 %v1783_v34 }
 0x12b   :  { %v317_v42 = vpop.f32.mrb[0].mxu0  ;;  %v358_v44 = vpop.f32.mrb[0].mxu1 }
 0x12c   :  { %v319_v45 = vpop.f32.mrb[1].mxu0  ;;  %v360_v47 = vpop.f32.mrb[1].mxu1  ;;  %v1808_v56 = vadd.f32 %v317_v42, %v106_v50  ;;  %v1817_v10 = vadd.f32 %v358_v44, %v114_v1 }
 0x12d   :  { %v321_v48 = vpop.f32.mrb[2].mxu0  ;;  %v362_v49 = vpop.f32.mrb[2].mxu1  ;;  %v1810_v57 = vadd.f32 %v319_v45, %v110_v53  ;;  %v1812_v60 = vadd.f32 %v360_v47, %v118_v54 }
 0x12e   :  { %v322_v51 = vpop.f32.mrb[3].mxu0  ;;  %v363_v52 = vpop.f32.mrb[3].mxu1 }
 0x133   :  { %v423_v58 = vpop.f32.mrb[4].mxu0  ;;  %v464_v59 = vpop.f32.mrb[4].mxu1 }
 0x134   :  { %v471_v61 = vadd.f32 %v423_v58, %v1808_v56  ;;  %v425_v62 = vpop.f32.mrb[5].mxu0  ;;  %v466_v63 = vpop.f32.mrb[5].mxu1  ;;  %v473_v11 = vadd.f32 %v464_v59, %v1817_v10 }
 0x135   :  { %v472_v2 = vadd.f32 %v425_v62, %v1810_v57  ;;  %v427_v3 = vpop.f32.mrb[6].mxu0  ;;  %v468_v4 = vpop.f32.mrb[6].mxu1  ;;  %v474_v9 = vadd.f32 %v466_v63, %v1812_v60 }
 0x136   :  { %v475_v5 = vmul.f32 0.5, %v471_v61  ;;  %v428_v6 = vpop.f32.mrb[7].mxu0  ;;  %v469_v7 = vpop.f32.mrb[7].mxu1  ;;  %v477_v12 = vmul.f32 0.5, %v473_v11 }
 0x137   :  { %v476_v8 = vmul.f32 0.5, %v472_v2 }
 0x138   :  { %1521 = vtanh.f32 %v475_v5 }
 0x139   :  { %1523 = vtanh.f32 %v476_v8 }
 0x13a   :  { %1525 = vtanh.f32 %v474_v9 }
 0x13b   :  { %1527 = vtanh.f32 %v477_v12 }
 0x142   :  { %v1522_v13 = vpop.eup %1521 }
 0x143   :  { %v481_v14 = vmul.f32 0.5, %v1522_v13  ;;  %v1524_v15 = vpop.eup %1523 }
 0x144   :  { %v482_v17 = vmul.f32 0.5, %v1524_v15  ;;  %v1526_v18 = vpop.eup %1525 }
 0x145   :  { %v484_v16 = vadd.f32 0.5, %v481_v14  ;;  %v1528_v23 = vpop.eup %1527 }
 0x146   :  { %v485_v19 = vadd.f32 0.5, %v482_v17  ;;  %v483_v24 = vmul.f32 0.5, %v1528_v23 }
 0x147   :  { %v489_v20 = vmul.f32 %v1526_v18, %v484_v16 }
 0x148   :  { %v488_v21 = vmul.f32 0.0, %v485_v19  ;;  %v486_v25 = vadd.f32 0.5, %v483_v24 }
 0x14a   :  { %v490_v22 = vadd.f32 %v489_v20, %v488_v21 }
 0x14c   :  { %1529 = vtanh.f32 %v490_v22  ;;  %v609_v62 = vrot.slane %v490_v22, 7 }
 0x156   :  { %v1530_v26 = vpop.eup %1529 }
 0x157   :  { %v492_v27 = vmul.f32 %v1530_v26, %v486_v25 }
 0x159   :  { %v493_v28 = vpack.c.bf16 %v492_v27, %v492_v27 }
 0x15b   :  { %1444 = vmatmul.mubr.msk.bf16.vlgmr.msra.gmra.mrb[8].mxu0 %vm385_vm0, %v493_v28  ;;  %1445 = vmatmul.mubr.msk.bf16.vlgmr.msra.gmra.mrb[8].mxu1 %vm385_vm0, %v493_v28 }
 0x15c   :  { %624 = vmatpush1.bf16.msra.mxu0 %v1785_v36  ;;  %665 = vmatpush1.bf16.msra.mxu1 %v1787_v37 }
 0x15d   :  { %655 = vmatprep.mubr.bf16.mxu0 %v1700_v0  ;;  %696 = vmatprep.mubr.bf16.mxu1 %v1700_v0 }
 0x15e   :  { %748 = vmatprep.subr.bf16.mxu0 %v1781_v33  ;;  %789 = vmatprep.subr.bf16.mxu1 %v1783_v34 }
 0x22e   :  { %v531_v29 = vpop.f32.mrb[8].mxu0  ;;  %v572_v30 = vpop.f32.mrb[8].mxu1 }
 0x22f   :  { %v583_v31 = vrot.slane %v531_v29, 7  ;;  %v533_v32 = vpop.f32.mrb[9].mxu0  ;;  %v574_v35 = vpop.f32.mrb[9].mxu1  ;;  %v585_v49 = vrot.slane %v572_v30, 7 }
 0x230   :  { %v584_v38 = vrot.slane %v533_v32, 7  ;;  %v535_v39 = vpop.f32.mrb[10].mxu0  ;;  %v576_v40 = vpop.f32.mrb[10].mxu1  ;;  %v586_v42 = vrot.slane %v574_v35, 7 }
 0x231   :  { %v591_v41 = vadd.f32 %v583_v31, %v1808_v56  ;;  %v536_v43 = vpop.f32.mrb[11].mxu0  ;;  %v577_v44 = vpop.f32.mrb[11].mxu1  ;;  %v593_v50 = vadd.f32 %v585_v49, %v1817_v10 }
 0x232   :  { %v592_v45 = vadd.f32 %v584_v38, %v1810_v57  ;;  %v594_v48 = vadd.f32 %v586_v42, %v1812_v60 }
 0x233   :  { %v595_v46 = vmul.f32 0.5, %v591_v41  ;;  %v597_v51 = vmul.f32 0.5, %v593_v50 }
 0x234   :  { %v596_v47 = vmul.f32 0.5, %v592_v45 }
 0x235   :  { %1531 = vtanh.f32 %v595_v46 }
 0x236   :  { %1533 = vtanh.f32 %v596_v47 }
 0x237   :  { %1535 = vtanh.f32 %v594_v48 }
 0x238   :  { %1537 = vtanh.f32 %v597_v51 }
 0x23f   :  { %v1532_v52 = vpop.eup %1531 }
 0x240   :  { %v601_v53 = vmul.f32 0.5, %v1532_v52  ;;  %v1534_v54 = vpop.eup %1533 }
 0x241   :  { %v602_v58 = vmul.f32 0.5, %v1534_v54  ;;  %v1536_v59 = vpop.eup %1535 }
 0x242   :  { %v604_v55 = vadd.f32 0.5, %v601_v53  ;;  %v1538_v3 = vpop.eup %1537 }
 0x243   :  { %v605_v61 = vadd.f32 0.5, %v602_v58  ;;  %v603_v4 = vmul.f32 0.5, %v1538_v3 }
 0x244   :  { %v612_v63 = vmul.f32 %v1536_v59, %v604_v55 }
 0x245   :  { %v611_v1 = vmul.f32 %v609_v62, %v605_v61  ;;  %v606_v5 = vadd.f32 0.5, %v603_v4 }
 0x247   :  { %v613_v2 = vadd.f32 %v612_v63, %v611_v1 }
 0x249   :  { %1539 = vtanh.f32 %v613_v2  ;;  %v735_v41 = vrot.slane %v613_v2, 7 }
 0x253   :  { %v1540_v6 = vpop.eup %1539 }
 0x254   :  { %v615_v7 = vmul.f32 %v1540_v6, %v606_v5 }
 0x256   :  { %v616_v8 = vpack.c.bf16 %v615_v7, %v615_v7 }
 0x258   :  { %v618_v9 = vshrl.u32 %v616_v8, 16 }
 0x25a   :  { %1446 = vmatmul.mubr.msk.bf16.vlgmr.msra.gmra.mrb[12].mxu0 %vm385_vm0, %v618_v9  ;;  %1447 = vmatmul.mubr.msk.bf16.vlgmr.msra.gmra.mrb[12].mxu1 %vm385_vm0, %v618_v9 }
 0x25b   :  { %749 = vmatpush1.bf16.msra.mxu0 %v1785_v36  ;;  %790 = vmatpush1.bf16.msra.mxu1 %v1787_v37 }
 0x25c   :  { %780 = vmatprep.mubr.bf16.mxu0 %v1700_v0  ;;  %821 = vmatprep.mubr.bf16.mxu1 %v1700_v0 }
 0x25d   :  { %875 = vmatprep.subr.bf16.mxu0 %v1781_v33  ;;  %916 = vmatprep.subr.bf16.mxu1 %v1783_v34 }
 0x32d   :  { %v657_v11 = vpop.f32.mrb[12].mxu0  ;;  %v698_v12 = vpop.f32.mrb[12].mxu1 }
 0x32e   :  { %v709_v13 = vrot.slane %v657_v11, 6  ;;  %v659_v14 = vpop.f32.mrb[13].mxu0  ;;  %v700_v15 = vpop.f32.mrb[13].mxu1  ;;  %v711_v27 = vrot.slane %v698_v12, 6 }
 0x32f   :  { %v710_v16 = vrot.slane %v659_v14, 6  ;;  %v661_v17 = vpop.f32.mrb[14].mxu0  ;;  %v702_v18 = vpop.f32.mrb[14].mxu1  ;;  %v712_v20 = vrot.slane %v700_v15, 6 }
 0x330   :  { %v717_v19 = vadd.f32 %v709_v13, %v1808_v56  ;;  %v662_v21 = vpop.f32.mrb[15].mxu0  ;;  %v703_v22 = vpop.f32.mrb[15].mxu1  ;;  %v719_v28 = vadd.f32 %v711_v27, %v1817_v10 }
 0x331   :  { %v718_v23 = vadd.f32 %v710_v16, %v1810_v57  ;;  %v720_v26 = vadd.f32 %v712_v20, %v1812_v60 }
 0x332   :  { %v721_v24 = vmul.f32 0.5, %v717_v19  ;;  %v723_v29 = vmul.f32 0.5, %v719_v28 }
 0x333   :  { %v722_v25 = vmul.f32 0.5, %v718_v23 }
 0x334   :  { %1541 = vtanh.f32 %v721_v24 }
 0x335   :  { %1543 = vtanh.f32 %v722_v25 }
 0x336   :  { %1545 = vtanh.f32 %v720_v26 }
 0x337   :  { %1547 = vtanh.f32 %v723_v29 }
 0x33e   :  { %v1542_v30 = vpop.eup %1541 }
 0x33f   :  { %v727_v31 = vmul.f32 0.5, %v1542_v30  ;;  %v1544_v32 = vpop.eup %1543 }
 0x340   :  { %v728_v38 = vmul.f32 0.5, %v1544_v32  ;;  %v1546_v39 = vpop.eup %1545 }
 0x341   :  { %v730_v35 = vadd.f32 0.5, %v727_v31  ;;  %v1548_v45 = vpop.eup %1547 }
 0x342   :  { %v731_v40 = vadd.f32 0.5, %v728_v38  ;;  %v729_v46 = vmul.f32 0.5, %v1548_v45 }
 0x343   :  { %v738_v42 = vmul.f32 %v1546_v39, %v730_v35 }
 0x344   :  { %v737_v43 = vmul.f32 %v735_v41, %v731_v40  ;;  %v732_v47 = vadd.f32 0.5, %v729_v46 }
 0x346   :  { %v739_v44 = vadd.f32 %v738_v42, %v737_v43 }
 0x348   :  { %1549 = vtanh.f32 %v739_v44  ;;  %v860_v19 = vrot.slane %v739_v44, 7 }
 0x352   :  { %v1550_v48 = vpop.eup %1549 }
 0x353   :  { %v741_v49 = vmul.f32 %v1550_v48, %v732_v47 }
 0x355   :  { %v742_v50 = vpack.c.bf16 %v741_v49, %v741_v49 }
 0x357   :  { %v744_v51 = vrot.slane %v742_v50, 1 }
 0x359   :  { %1448 = vmatmul.mubr.msk.bf16.vlgmr.msra.gmra.mrb[16].mxu0 %vm385_vm0, %v744_v51  ;;  %1449 = vmatmul.mubr.msk.bf16.vlgmr.msra.gmra.mrb[16].mxu1 %vm385_vm0, %v744_v51 }
 0x35a   :  { %876 = vmatpush1.bf16.msra.mxu0 %v1785_v36  ;;  %917 = vmatpush1.bf16.msra.mxu1 %v1787_v37 }
 0x35b   :  { %907 = vmatprep.mubr.bf16.mxu0 %v1700_v0  ;;  %948 = vmatprep.mubr.bf16.mxu1 %v1700_v0 }
 0x35c   :  { %1000 = vmatprep.subr.bf16.mxu0 %v1781_v33  ;;  %1041 = vmatprep.subr.bf16.mxu1 %v1783_v34 }
 0x42c   :  { %v782_v52 = vpop.f32.mrb[16].mxu0  ;;  %v823_v53 = vpop.f32.mrb[16].mxu1 }
 0x42d   :  { %v834_v54 = vrot.slane %v782_v52, 5  ;;  %v784_v55 = vpop.f32.mrb[17].mxu0  ;;  %v825_v58 = vpop.f32.mrb[17].mxu1  ;;  %v836_v8 = vrot.slane %v823_v53, 5 }
 0x42e   :  { %v835_v59 = vrot.slane %v784_v55, 5  ;;  %v786_v61 = vpop.f32.mrb[18].mxu0  ;;  %v827_v62 = vpop.f32.mrb[18].mxu1  ;;  %v837_v1 = vrot.slane %v825_v58, 5 }
 0x42f   :  { %v842_v63 = vadd.f32 %v834_v54, %v1808_v56  ;;  %v787_v2 = vpop.f32.mrb[19].mxu0  ;;  %v828_v3 = vpop.f32.mrb[19].mxu1  ;;  %v844_v9 = vadd.f32 %v836_v8, %v1817_v10 }
 0x430   :  { %v843_v4 = vadd.f32 %v835_v59, %v1810_v57  ;;  %v845_v7 = vadd.f32 %v837_v1, %v1812_v60 }
 0x431   :  { %v846_v5 = vmul.f32 0.5, %v842_v63  ;;  %v848_v11 = vmul.f32 0.5, %v844_v9 }
 0x432   :  { %v847_v6 = vmul.f32 0.5, %v843_v4 }
 0x433   :  { %1551 = vtanh.f32 %v846_v5 }
 0x434   :  { %1553 = vtanh.f32 %v847_v6 }
 0x435   :  { %1555 = vtanh.f32 %v845_v7 }
 0x436   :  { %1557 = vtanh.f32 %v848_v11 }
 0x43d   :  { %v1552_v12 = vpop.eup %1551 }
 0x43e   :  { %v852_v13 = vmul.f32 0.5, %v1552_v12  ;;  %v1554_v14 = vpop.eup %1553 }
 0x43f   :  { %v853_v16 = vmul.f32 0.5, %v1554_v14  ;;  %v1556_v17 = vpop.eup %1555 }
 0x440   :  { %v855_v15 = vadd.f32 0.5, %v852_v13  ;;  %v1558_v23 = vpop.eup %1557 }
 0x441   :  { %v856_v18 = vadd.f32 0.5, %v853_v16  ;;  %v854_v24 = vmul.f32 0.5, %v1558_v23 }
 0x442   :  { %v863_v20 = vmul.f32 %v1556_v17, %v855_v15 }
 0x443   :  { %v862_v21 = vmul.f32 %v860_v19, %v856_v18  ;;  %v857_v25 = vadd.f32 0.5, %v854_v24 }
 0x445   :  { %v864_v22 = vadd.f32 %v863_v20, %v862_v21 }
 0x447   :  { %1559 = vtanh.f32 %v864_v22  ;;  %v987_v1 = vrot.slane %v864_v22, 7 }
 0x451   :  { %v1560_v26 = vpop.eup %1559 }
 0x452   :  { %v866_v27 = vmul.f32 %v1560_v26, %v857_v25 }
 0x454   :  { %v867_v28 = vpack.c.bf16 %v866_v27, %v866_v27 }
 0x456   :  { %v869_v29 = vshrl.u32 %v867_v28, 16 }
 0x458   :  { %v871_v30 = vrot.slane %v869_v29, 1 }
 0x45a   :  { %1450 = vmatmul.mubr.msk.bf16.vlgmr.msra.gmra.mrb[20].mxu0 %vm385_vm0, %v871_v30  ;;  %1451 = vmatmul.mubr.msk.bf16.vlgmr.msra.gmra.mrb[20].mxu1 %vm385_vm0, %v871_v30 }
 0x45b   :  { %1001 = vmatpush1.bf16.msra.mxu0 %v1785_v36  ;;  %1042 = vmatpush1.bf16.msra.mxu1 %v1787_v37 }
 0x45c   :  { %1032 = vmatprep.mubr.bf16.mxu0 %v1700_v0  ;;  %1073 = vmatprep.mubr.bf16.mxu1 %v1700_v0 }
 0x45d   :  { %1127 = vmatprep.subr.bf16.mxu0 %v1781_v33  ;;  %1168 = vmatprep.subr.bf16.mxu1 %v1783_v34 }
 0x52d   :  { %v909_v31 = vpop.f32.mrb[20].mxu0  ;;  %v950_v32 = vpop.f32.mrb[20].mxu1 }
 0x52e   :  { %v961_v35 = vrot.slane %v909_v31, 4  ;;  %v911_v38 = vpop.f32.mrb[21].mxu0  ;;  %v952_v39 = vpop.f32.mrb[21].mxu1  ;;  %v963_v51 = vrot.slane %v950_v32, 4 }
 0x52f   :  { %v962_v40 = vrot.slane %v911_v38, 4  ;;  %v913_v41 = vpop.f32.mrb[22].mxu0  ;;  %v954_v42 = vpop.f32.mrb[22].mxu1  ;;  %v964_v44 = vrot.slane %v952_v39, 4 }
 0x530   :  { %v969_v43 = vadd.f32 %v961_v35, %v1808_v56  ;;  %v914_v45 = vpop.f32.mrb[23].mxu0  ;;  %v955_v46 = vpop.f32.mrb[23].mxu1  ;;  %v971_v52 = vadd.f32 %v963_v51, %v1817_v10 }
 0x531   :  { %v970_v47 = vadd.f32 %v962_v40, %v1810_v57  ;;  %v972_v50 = vadd.f32 %v964_v44, %v1812_v60 }
 0x532   :  { %v973_v48 = vmul.f32 0.5, %v969_v43  ;;  %v975_v53 = vmul.f32 0.5, %v971_v52 }
 0x533   :  { %v974_v49 = vmul.f32 0.5, %v970_v47 }
 0x534   :  { %1561 = vtanh.f32 %v973_v48 }
 0x535   :  { %1563 = vtanh.f32 %v974_v49 }
 0x536   :  { %1565 = vtanh.f32 %v972_v50 }
 0x537   :  { %1567 = vtanh.f32 %v975_v53 }
 0x53e   :  { %v1562_v54 = vpop.eup %1561 }
 0x53f   :  { %v979_v55 = vmul.f32 0.5, %v1562_v54  ;;  %v1564_v58 = vpop.eup %1563 }
 0x540   :  { %v980_v61 = vmul.f32 0.5, %v1564_v58  ;;  %v1566_v62 = vpop.eup %1565 }
 0x541   :  { %v982_v59 = vadd.f32 0.5, %v979_v55  ;;  %v1568_v5 = vpop.eup %1567 }
 0x542   :  { %v983_v63 = vadd.f32 0.5, %v980_v61  ;;  %v981_v6 = vmul.f32 0.5, %v1568_v5 }
 0x543   :  { %v990_v2 = vmul.f32 %v1566_v62, %v982_v59 }
 0x544   :  { %v989_v3 = vmul.f32 %v987_v1, %v983_v63  ;;  %v984_v7 = vadd.f32 0.5, %v981_v6 }
 0x546   :  { %v991_v4 = vadd.f32 %v990_v2, %v989_v3 }
 0x548   :  { %1569 = vtanh.f32 %v991_v4  ;;  %v1112_v41 = vrot.slane %v991_v4, 7 }
 0x552   :  { %v1570_v8 = vpop.eup %1569 }
 0x553   :  { %v993_v9 = vmul.f32 %v1570_v8, %v984_v7 }
 0x555   :  { %v994_v11 = vpack.c.bf16 %v993_v9, %v993_v9 }
 0x557   :  { %v996_v12 = vrot.slane %v994_v11, 2 }
 0x559   :  { %1452 = vmatmul.mubr.msk.bf16.vlgmr.msra.gmra.mrb[24].mxu0 %vm385_vm0, %v996_v12  ;;  %1453 = vmatmul.mubr.msk.bf16.vlgmr.msra.gmra.mrb[24].mxu1 %vm385_vm0, %v996_v12 }
 0x55a   :  { %1128 = vmatpush1.bf16.msra.mxu0 %v1785_v36  ;;  %1169 = vmatpush1.bf16.msra.mxu1 %v1787_v37 }
 0x55b   :  { %1159 = vmatprep.mubr.bf16.mxu0 %v1700_v0  ;;  %1200 = vmatprep.mubr.bf16.mxu1 %v1700_v0 }
 0x55c   :  { %1252 = vmatprep.subr.bf16.mxu0 %v1781_v33  ;;  %1293 = vmatprep.subr.bf16.mxu1 %v1783_v34 }
 0x62c   :  { %v1034_v13 = vpop.f32.mrb[24].mxu0  ;;  %v1075_v14 = vpop.f32.mrb[24].mxu1 }
 0x62d   :  { %v1086_v15 = vrot.slane %v1034_v13, 3  ;;  %v1036_v16 = vpop.f32.mrb[25].mxu0  ;;  %v1077_v17 = vpop.f32.mrb[25].mxu1  ;;  %v1088_v34 = vrot.slane %v1075_v14, 3 }
 0x62e   :  { %v1087_v18 = vrot.slane %v1036_v16, 3  ;;  %v1038_v19 = vpop.f32.mrb[26].mxu0  ;;  %v1079_v20 = vpop.f32.mrb[26].mxu1  ;;  %v1089_v22 = vrot.slane %v1077_v17, 3 }
 0x62f   :  { %v1094_v21 = vadd.f32 %v1086_v15, %v1808_v56  ;;  %v1039_v23 = vpop.f32.mrb[27].mxu0  ;;  %v1080_v24 = vpop.f32.mrb[27].mxu1  ;;  %v1096_v28 = vadd.f32 %v1088_v34, %v1817_v10 }
 0x630   :  { %v1095_v25 = vadd.f32 %v1087_v18, %v1810_v57  ;;  %v1097_v33 = vadd.f32 %v1089_v22, %v1812_v60 }
 0x631   :  { %v1098_v26 = vmul.f32 0.5, %v1094_v21  ;;  %v1100_v29 = vmul.f32 0.5, %v1096_v28 }
 0x632   :  { %v1099_v27 = vmul.f32 0.5, %v1095_v25 }
 0x633   :  { %1571 = vtanh.f32 %v1098_v26 }
 0x634   :  { %1573 = vtanh.f32 %v1099_v27 }
 0x635   :  { %1575 = vtanh.f32 %v1097_v33 }
 0x636   :  { %1577 = vtanh.f32 %v1100_v29 }
 0x63d   :  { %v1572_v30 = vpop.eup %1571 }
 0x63e   :  { %v1104_v31 = vmul.f32 0.5, %v1572_v30  ;;  %v1574_v32 = vpop.eup %1573 }
 0x63f   :  { %v1105_v38 = vmul.f32 0.5, %v1574_v32  ;;  %v1576_v39 = vpop.eup %1575 }
 0x640   :  { %v1107_v35 = vadd.f32 0.5, %v1104_v31  ;;  %v1578_v45 = vpop.eup %1577 }
 0x641   :  { %v1108_v40 = vadd.f32 0.5, %v1105_v38  ;;  %v1106_v46 = vmul.f32 0.5, %v1578_v45 }
 0x642   :  { %v1115_v42 = vmul.f32 %v1576_v39, %v1107_v35 }
 0x643   :  { %v1114_v43 = vmul.f32 %v1112_v41, %v1108_v40  ;;  %v1109_v47 = vadd.f32 0.5, %v1106_v46 }
 0x645   :  { %v1116_v44 = vadd.f32 %v1115_v42, %v1114_v43 }
 0x647   :  { %1579 = vtanh.f32 %v1116_v44  ;;  %v1239_v17 = vrot.slane %v1116_v44, 7 }
 0x651   :  { %v1580_v48 = vpop.eup %1579 }
 0x652   :  { %v1118_v49 = vmul.f32 %v1580_v48, %v1109_v47 }
 0x654   :  { %v1119_v50 = vpack.c.bf16 %v1118_v49, %v1118_v49 }
 0x656   :  { %v1121_v51 = vshrl.u32 %v1119_v50, 16 }
 0x658   :  { %v1123_v52 = vrot.slane %v1121_v51, 2 }
 0x65a   :  { %1454 = vmatmul.mubr.msk.bf16.vlgmr.msra.gmra.mrb[28].mxu0 %vm385_vm0, %v1123_v52  ;;  %1455 = vmatmul.mubr.msk.bf16.vlgmr.msra.gmra.mrb[28].mxu1 %vm385_vm0, %v1123_v52 }
 0x65b   :  { %1253 = vmatpush1.bf16.msra.mxu0 %v1785_v36  ;;  %1294 = vmatpush1.bf16.msra.mxu1 %v1787_v37 }
 0x65c   :  { %1284 = vmatprep.mubr.bf16.mxu0 %v1700_v0  ;;  %1325 = vmatprep.mubr.bf16.mxu1 %v1700_v0 }
 0x72d   :  { %v1161_v53 = vpop.f32.mrb[28].mxu0  ;;  %v1202_v54 = vpop.f32.mrb[28].mxu1 }
 0x72e   :  { %v1213_v55 = vrot.slane %v1161_v53, 2  ;;  %v1163_v58 = vpop.f32.mrb[29].mxu0  ;;  %v1204_v59 = vpop.f32.mrb[29].mxu1  ;;  %v1215_v6 = vrot.slane %v1202_v54, 2 }
 0x72f   :  { %v1214_v61 = vrot.slane %v1163_v58, 2  ;;  %v1165_v62 = vpop.f32.mrb[30].mxu0  ;;  %v1206_v63 = vpop.f32.mrb[30].mxu1  ;;  %v1216_v2 = vrot.slane %v1204_v59, 2 }
 0x730   :  { %v1221_v1 = vadd.f32 %v1213_v55, %v1808_v56  ;;  %v1166_v3 = vpop.f32.mrb[31].mxu0  ;;  %v1207_v4 = vpop.f32.mrb[31].mxu1  ;;  %v1223_v7 = vadd.f32 %v1215_v6, %v1817_v10 }
 0x731   :  { %v1222_v36 = vadd.f32 %v1214_v61, %v1810_v57  ;;  %v1224_v0 = vadd.f32 %v1216_v2, %v1812_v60  ;;  %v1459_v4 = vld [vmem:[%s1919_s5] ss:$0 sm:$0xff] }
 0x732   :  { %v1225_v37 = vmul.f32 0.5, %v1221_v1  ;;  %v1227_v8 = vmul.f32 0.5, %v1223_v7 }
 0x733   :  { %v1226_v5 = vmul.f32 0.5, %v1222_v36 }
 0x734   :  { %1581 = vtanh.f32 %v1225_v37 }
 0x735   :  { %1583 = vtanh.f32 %v1226_v5 }
 0x736   :  { %1585 = vtanh.f32 %v1224_v0 }
 0x737   :  { %1587 = vtanh.f32 %v1227_v8 }
 0x73e   :  { %v1582_v9 = vpop.eup %1581 }
 0x73f   :  { %v1231_v11 = vmul.f32 0.5, %v1582_v9  ;;  %v1584_v12 = vpop.eup %1583 }
 0x740   :  { %v1232_v14 = vmul.f32 0.5, %v1584_v12  ;;  %v1586_v15 = vpop.eup %1585 }
 0x741   :  { %v1234_v13 = vadd.f32 0.5, %v1231_v11  ;;  %v1588_v21 = vpop.eup %1587 }
 0x742   :  { %v1235_v16 = vadd.f32 0.5, %v1232_v14  ;;  %v1233_v22 = vmul.f32 0.5, %v1588_v21 }
 0x743   :  { %v1242_v18 = vmul.f32 %v1586_v15, %v1234_v13 }
 0x744   :  { %v1241_v19 = vmul.f32 %v1239_v17, %v1235_v16  ;;  %v1236_v23 = vadd.f32 0.5, %v1233_v22 }
 0x746   :  { %v1243_v20 = vadd.f32 %v1242_v18, %v1241_v19 }
 0x748   :  { %1589 = vtanh.f32 %v1243_v20 }
 0x752   :  { %v1590_v24 = vpop.eup %1589 }
 0x753   :  { %v1245_v25 = vmul.f32 %v1590_v24, %v1236_v23 }
 0x755   :  { %v1246_v26 = vpack.c.bf16 %v1245_v25, %v1245_v25 }
 0x757   :  { %v1248_v27 = vrot.slane %v1246_v26, 3 }
 0x759   :  { %1456 = vmatmul.mubr.msk.bf16.vlgmr.msra.gmra.mrb[32].mxu0 %vm385_vm0, %v1248_v27  ;;  %1457 = vmatmul.mubr.msk.bf16.vlgmr.msra.gmra.mrb[32].mxu1 %vm385_vm0, %v1248_v27 }
 0x82c   :  { %v1286_v33 = vpop.f32.mrb[32].mxu0  ;;  %v1327_v34 = vpop.f32.mrb[32].mxu1 }
 0x82d   :  { %v1338_v28 = vrot.slane %v1286_v33, 1  ;;  %v1288_v29 = vpop.f32.mrb[33].mxu0  ;;  %v1329_v30 = vpop.f32.mrb[33].mxu1  ;;  %v1340_v46 = vrot.slane %v1327_v34, 1 }
 0x82e   :  { %v1339_v31 = vrot.slane %v1288_v29, 1  ;;  %v1290_v32 = vpop.f32.mrb[34].mxu0  ;;  %v1331_v35 = vpop.f32.mrb[34].mxu1  ;;  %v1341_v39 = vrot.slane %v1329_v30, 1 }
 0x82f   :  { %v1346_v38 = vadd.f32 %v1338_v28, %v1808_v56  ;;  %v1291_v40 = vpop.f32.mrb[35].mxu0  ;;  %v1332_v41 = vpop.f32.mrb[35].mxu1  ;;  %v1348_v47 = vadd.f32 %v1340_v46, %v1817_v10  ;;  %v1458_v10 = vld [vmem:[%s1918_s4] ss:$0 sm:$0xff] }
 0x830   :  { %v1347_v42 = vadd.f32 %v1339_v31, %v1810_v57  ;;  %v1349_v45 = vadd.f32 %v1341_v39, %v1812_v60  ;;  %v1364_v57 = vrot.slane %v1243_v20, 7 }
 0x831   :  { %v1350_v43 = vmul.f32 0.5, %v1346_v38  ;;  %v1352_v48 = vmul.f32 0.5, %v1348_v47 }
 0x832   :  { %v1351_v44 = vmul.f32 0.5, %v1347_v42 }
 0x833   :  { %1591 = vtanh.f32 %v1350_v43 }
 0x834   :  { %1593 = vtanh.f32 %v1351_v44 }
 0x835   :  { %1595 = vtanh.f32 %v1349_v45 }
 0x836   :  { %1597 = vtanh.f32 %v1352_v48 }
 0x83d   :  { %v1592_v49 = vpop.eup %1591 }
 0x83e   :  { %v1356_v50 = vmul.f32 0.5, %v1592_v49  ;;  %v1594_v51 = vpop.eup %1593 }
 0x83f   :  { %v1357_v52 = vmul.f32 0.5, %v1594_v51  ;;  %v1596_v53 = vpop.eup %1595 }
 0x840   :  { %v1359_v56 = vadd.f32 0.5, %v1356_v50  ;;  %v1598_v60 = vpop.eup %1597 }
 0x841   :  { %v1360_v54 = vadd.f32 0.5, %v1357_v52  ;;  %v1358_v61 = vmul.f32 0.5, %v1598_v60 }
 0x842   :  { %v1367_v55 = vmul.f32 %v1596_v53, %v1359_v56 }
 0x843   :  { %v1366_v58 = vmul.f32 %v1364_v57, %v1360_v54  ;;  %v1361_v62 = vadd.f32 0.5, %v1358_v61 }
 0x845   :  { %v1368_v59 = vadd.f32 %v1367_v55, %v1366_v58 }
 0x847   :  { %1599 = vtanh.f32 %v1368_v59 }
 0x851   :  { %v1600_v63 = vpop.eup %1599 }
 0x852   :  { %v1370_v1 = vmul.f32 %v1600_v63, %v1361_v62 }
 0x854   :  { %v1378_v2 = vmul.f32 %v1458_v10, %v1370_v1 }
 0x856   :  { %v1380_v3 = vsel %vm1379_vm1, %v1378_v2, 0.0 }
 0x857   :  { %1381 = vadd.xlane.f32.xlu0 %v1380_v3 }
 0x8e4   :  { %v1382_v36 = vpop.xlane.xlu0 %1381 }
 0x8e5   :  { %v1390_v37 = vadd.f32 %v1459_v4, %v1382_v36 }
 0x8e7   :  { %1391 = vst [vmem:[#allocation8 - $0x7] sm:$0x80] %v1390_v37 }
 0x8e8   :  { %1678 = shalt.err (!%p1675_p0)
}
 0x8e9   :  { %s1679_s18 = scalar_lea.hbm %s1920_s6, 16 }
 0x8ea   :  { %p1680_p1 = scmp.ne.s32.totalorder %s1920_s6, %s1679_s18  ;;  %p1683_p2 = scmp.lt.u32.totalorder %s1679_s18, %s1920_s6 }
 0x8ec   :  { %p1685_p3 = pnand %p1683_p2, %p1680_p1 }
 0x8ee   :  { %1688 = shalt.err (!%p1685_p3)
}
 0x8ef   :  { %1401 = dma.vmem_to_hbm [thread:$0]  %s1399_s14, 16, %s1920_s6, [#allocation4]  }
 0x8f0   :  { %1693 = dma.done.wait [#allocation4], 16  }
 0x8f1   :  { %1694 = vsyncadd [#allocation4], 4294967280 }
 0x8f2   :  { %1405 = vsyncpa [#allocation3], 1 }
 0x8f3   :  { %1406 = vsyncpa [#allocation6], 1 }
 0x8f4   :  { %1407 = vsyncpa [#allocation4], 1 }

</bundles_post_ra>
